<compile_context>
chip_gen: v7x
topology: tpu7x:2x2x1
jax: 0.10.0
libtpu: 0.0.40
codegen_flags: <defaults>
</compile_context>

<pallas_src>
import functools

import jax
import jax.numpy as jnp
from jax.experimental import pallas as pl
from jax.experimental.pallas import tpu as pltpu


def _round_up(n, m):
    return ((n + m - 1) // m) * m


# ------------------------------ kernel bodies --------------------------------

def _mlp_logits(z_ref, w1_ref, b1_ref, w2_ref, b2_ref):
    """(TILE_B,Mp)@(Mp,HIDp) -> ReLU -> (TILE_B,HIDp)@(HIDp,OUTp) + bias.

    MXU inputs are bf16, accumulation + elementwise tail in f32.
    """
    h = jnp.dot(z_ref[...], w1_ref[...], preferred_element_type=jnp.float32)
    h = jnp.maximum(h + b1_ref[...], 0.0)                         # f32 VPU
    logits = jnp.dot(h.astype(jnp.bfloat16), w2_ref[...],
                     preferred_element_type=jnp.float32)
    return logits + b2_ref[...]


def _forward_kernel(z_ref, w1_ref, b1_ref, w2_ref, b2_ref,
                    logits_ref, probs_ref):
    """Module forward: distribution parameters of Independent(Bernoulli(logits), 2)."""
    logits = _mlp_logits(z_ref, w1_ref, b1_ref, w2_ref, b2_ref)
    logits_ref[...] = logits
    probs_ref[...] = jax.nn.sigmoid(logits)                       # Bernoulli mean


def _fused_logprob_kernel(z_ref, x_ref, w1_ref, b1_ref, w2_ref, b2_ref,
                          logits_ref, probs_ref, lp_ref, *, valid_out):
    """Forward + Independent(...,2).log_prob(x) fused in a single kernel."""
    logits = _mlp_logits(z_ref, w1_ref, b1_ref, w2_ref, b2_ref)
    logits_ref[...] = logits
    probs_ref[...] = jax.nn.sigmoid(logits)
    # Numerically stable Bernoulli log-pmf: x*logits - softplus(logits)   (f32, EUP/VPU)
    elem = x_ref[...] * logits - jax.nn.softplus(logits)
    if valid_out != elem.shape[-1]:
        # Mask zero-padded event columns so they don't pollute the reduction.
        col = jax.lax.broadcasted_iota(jnp.int32, elem.shape, 1)
        elem = jnp.where(col < valid_out, elem, 0.0)
    # Independent(..., 2): sum over the (flattened) last two event dims.
    lp = jnp.sum(elem, axis=-1, keepdims=True)                    # (TILE_B, 1)
    # Lane-dense store (unmasked vst); wrapper reads column 0.
    lp_ref[...] = jnp.broadcast_to(lp, lp_ref.shape)


# ------------------------------ wrappers --------------------------------------

def prepare_decoder_params(w1, b1, w2, b2):
    """One-time: zero-pad weights to MXU-native widths (128) and cast to bf16."""
    M, HID = w1.shape
    OUT = w2.shape[1]
    Mp, HIDp, OUTp = (_round_up(d, 128) for d in (M, HID, OUT))
    w1_p = jnp.zeros((Mp, HIDp), jnp.float32).at[:M, :HID].set(w1).astype(jnp.bfloat16)
    b1_p = jnp.zeros((1, HIDp), jnp.float32).at[:, :HID].set(b1.reshape(1, HID))
    w2_p = jnp.zeros((HIDp, OUTp), jnp.float32).at[:HID, :OUT].set(w2).astype(jnp.bfloat16)
    b2_p = jnp.zeros((1, OUTp), jnp.float32).at[:, :OUT].set(b2.reshape(1, OUT))
    return dict(w1=w1_p, b1=b1_p, w2=w2_p, b2=b2_p, M=M, HID=HID, OUT=OUT)


def bernoulli_decoder_forward(z, prep, H, W, x=None, tile_b=128):
    """Forward pass of BernoulliDecoder.

    Returns (logits, probs) of shape (B, H, W) — the parameters/mean of
    td.Independent(td.Bernoulli(logits=decoder_net(z)), 2).  If `x` (a binary
    observation, (B, H, W)) is given, additionally returns the fused
    log_prob(x) of shape (B,), computed in the SAME kernel (no logits
    HBM round-trip and no second pallas_call).
    """
    w1_p, b1_p, w2_p, b2_p = prep["w1"], prep["b1"], prep["w2"], prep["b2"]
    B, M = z.shape
    OUT = prep["OUT"]
    assert OUT == H * W
    Mp, HIDp = w1_p.shape
    OUTp = w2_p.shape[1]

    # Batch tiling: TILE_B sublane-aligned; everything else is a full-array block.
    TILE_B = min(tile_b, _round_up(B, 8))
    B_pad = _round_up(B, TILE_B)
    n_tiles = B_pad // TILE_B

    # Pad latent batch (rows beyond B are zeros and are sliced off afterwards),
    # and cast the MXU operand to bf16 (halves DMA bytes too).
    z_p = jnp.zeros((B_pad, Mp), jnp.float32).at[:B, :M].set(z).astype(jnp.bfloat16)

    row_spec = lambda cols: pl.BlockSpec((TILE_B, cols), lambda i: (i, 0))
    res_spec = lambda shape: pl.BlockSpec(shape, lambda i: (0, 0))  # VMEM-resident weights

    weight_specs = [
        res_spec((Mp, HIDp)),    # w1 (bf16)
        res_spec((1, HIDp)),     # b1 (f32)
        res_spec((HIDp, OUTp)),  # w2 (bf16)
        res_spec((1, OUTp)),     # b2 (f32)
    ]
    lg_pb_shapes = (
        jax.ShapeDtypeStruct((B_pad, OUTp), jnp.float32),
        jax.ShapeDtypeStruct((B_pad, OUTp), jnp.float32),
    )
    compiler_params = pltpu.CompilerParams(
        dimension_semantics=("parallel",),           # shards across TCs on v7x
        vmem_limit_bytes=32 * 1024 * 1024,           # explicit; fits v5e/v6e/v7x budgets
    )

    if x is None:
        logits_p, probs_p = pl.pallas_call(
            _forward_kernel,
            out_shape=lg_pb_shapes,
            grid=(n_tiles,),
            in_specs=[row_spec(Mp)] + weight_specs,
            out_specs=(row_spec(OUTp), row_spec(OUTp)),
            compiler_params=compiler_params,
        )(z_p, w1_p, b1_p, w2_p, b2_p)
        logits = logits_p[:B, :OUT].reshape(B, H, W)
        probs = probs_p[:B, :OUT].reshape(B, H, W)
        return logits, probs

    x_p = jnp.zeros((B_pad, OUTp), jnp.float32).at[:B, :OUT].set(
        x.reshape(B, OUT).astype(jnp.float32))
    kernel = functools.partial(_fused_logprob_kernel, valid_out=OUT)
    logits_p, probs_p, lp_p = pl.pallas_call(
        kernel,
        out_shape=lg_pb_shapes + (jax.ShapeDtypeStruct((B_pad, 128), jnp.float32),),
        grid=(n_tiles,),
        in_specs=[row_spec(Mp), row_spec(OUTp)] + weight_specs,
        out_specs=(row_spec(OUTp), row_spec(OUTp),
                   pl.BlockSpec((TILE_B, 128), lambda i: (i, 0))),  # lane-dense lp
        compiler_params=compiler_params,
    )(z_p, x_p, w1_p, b1_p, w2_p, b2_p)
    logits = logits_p[:B, :OUT].reshape(B, H, W)
    probs = probs_p[:B, :OUT].reshape(B, H, W)
    lp = lp_p[:B, 0]
    return logits, probs, lp


# --------------------------------- main ---------------------------------------

if __name__ == "__main__":
    B, M, HID, H, W = 8, 32, 64, 16, 16   # small, module-consistent shapes

    key = jax.random.PRNGKey(0)
    kz, kw1, kb1, kw2, kb2, kx = jax.random.split(key, 6)

    # Deterministic "decoder_net" parameters: Linear(M,HID) -> ReLU -> Linear(HID,H*W).
    w1 = jax.random.normal(kw1, (M, HID), jnp.float32) * 0.1
    b1 = jax.random.normal(kb1, (1, HID), jnp.float32) * 0.01
    w2 = jax.random.normal(kw2, (HID, H * W), jnp.float32) * 0.1
    b2 = jax.random.normal(kb2, (1, H * W), jnp.float32) * 0.01

    z = jax.random.normal(kz, (B, M), jnp.float32)
    x_obs = (jax.random.uniform(kx, (B, H, W)) > 0.5).astype(jnp.float32)

    # One-time weight padding / bf16 cast.
    prep = prepare_decoder_params(w1, b1, w2, b2)

    # Module forward: distribution parameters (logits) + Bernoulli mean.
    logits_f, probs_f = bernoulli_decoder_forward(z, prep, H, W)
    # Fused forward + Independent(...,2).log_prob(x): single pallas_call.
    logits, probs, lp = bernoulli_decoder_forward(z, prep, H, W, x=x_obs)
    jax.block_until_ready((logits_f, probs_f, logits, probs, lp))

    # Correctness check against plain f32 JAX (kernel uses bf16 MXU operands,
    # so tolerances are loosened accordingly — expected precision change).
    h_ref = jnp.maximum(z @ w1 + b1, 0.0)
    logits_ref = (h_ref @ w2 + b2).reshape(B, H, W)
    probs_ref = jax.nn.sigmoid(logits_ref)
    lp_ref = jnp.sum(x_obs * logits_ref - jax.nn.softplus(logits_ref), axis=(1, 2))

    assert jnp.allclose(logits, logits_ref, atol=5e-2, rtol=5e-2)
    assert jnp.allclose(probs, probs_ref, atol=2e-2, rtol=2e-2)
    assert jnp.allclose(lp, lp_ref, atol=1.0, rtol=2e-2)
    # Forward-only path must agree with the fused path.
    assert jnp.allclose(logits_f, logits, atol=1e-5, rtol=1e-5)
    assert jnp.allclose(probs_f, probs, atol=1e-5, rtol=1e-5)

    # TODO(synk): td.Independent(td.Bernoulli(...), 2) as a *distribution object*
    # (sampling API etc.) has no kernel equivalent; we return its parameters
    # (logits, mean=sigmoid(logits)) and implement its log_prob reduction fused.
    print("KERNEL_OK")
</pallas_src>

<mosaic_0001>
module attributes {stable_mosaic.version = 11 : i64} {
  func.func @_forward_kernel(%arg0: i32, %arg1: memref<8x128xbf16, #tpu.memory_space<vmem>>, %arg2: memref<128x128xbf16, #tpu.memory_space<vmem>>, %arg3: memref<1x128xf32, #tpu.memory_space<vmem>>, %arg4: memref<128x256xbf16, #tpu.memory_space<vmem>>, %arg5: memref<1x256xf32, #tpu.memory_space<vmem>>, %arg6: memref<8x256xf32, #tpu.memory_space<vmem>>, %arg7: memref<8x256xf32, #tpu.memory_space<vmem>>) attributes {dimension_semantics = [#tpu.dimension_semantics<parallel>], iteration_bounds = array<i64: 1>, scalar_prefetch = 0 : i64, scratch_operands = 0 : i64, tpu.core_type = #tpu.core_type<tc>, window_params = [{transform_indices = @transform_0, window_bounds = array<i64: 8, 128>}, {pipeline_mode = #tpu.pipeline_mode<synchronous>, transform_indices = @transform_1, window_bounds = array<i64: 128, 128>}, {pipeline_mode = #tpu.pipeline_mode<synchronous>, transform_indices = @transform_2, window_bounds = array<i64: 1, 128>}, {pipeline_mode = #tpu.pipeline_mode<synchronous>, transform_indices = @transform_3, window_bounds = array<i64: 128, 256>}, {pipeline_mode = #tpu.pipeline_mode<synchronous>, transform_indices = @transform_4, window_bounds = array<i64: 1, 256>}, {transform_indices = @transform_5, window_bounds = array<i64: 8, 256>}, {transform_indices = @transform_6, window_bounds = array<i64: 8, 256>}]} {
    %c0 = arith.constant 0 : index
    %c0_0 = arith.constant 0 : index
    %0 = vector.load %arg1[%c0, %c0_0] : memref<8x128xbf16, #tpu.memory_space<vmem>>, vector<8x128xbf16>
    %c0_1 = arith.constant 0 : index
    %c0_2 = arith.constant 0 : index
    %1 = vector.load %arg2[%c0_1, %c0_2] : memref<128x128xbf16, #tpu.memory_space<vmem>>, vector<128x128xbf16>
    %cst = arith.constant dense<0.000000e+00> : vector<8x128xf32>
    %2 = tpu.matmul %0, %1, %cst {dimension_numbers = #tpu.dot_dimension_numbers<[1], [0], [0], [1], [0, 0, 1, 1], [], []>} : vector<8x128xbf16>, vector<128x128xbf16>, vector<8x128xf32> -> vector<8x128xf32>
    %c0_3 = arith.constant 0 : index
    %c0_4 = arith.constant 0 : index
    %3 = vector.load %arg3[%c0_3, %c0_4] : memref<1x128xf32, #tpu.memory_space<vmem>>, vector<1x128xf32>
    %4 = vector.broadcast %3 : vector<1x128xf32> to vector<8x128xf32>
    %5 = arith.addf %2, %4 : vector<8x128xf32>
    %cst_5 = arith.constant 0.000000e+00 : f32
    %6 = vector.broadcast %cst_5 : f32 to vector<8x128xf32>
    %7 = arith.maximumf %5, %6 : vector<8x128xf32>
    %8 = arith.truncf %7 : vector<8x128xf32> to vector<8x128xbf16>
    %c0_6 = arith.constant 0 : index
    %c0_7 = arith.constant 0 : index
    %9 = vector.load %arg4[%c0_6, %c0_7] : memref<128x256xbf16, #tpu.memory_space<vmem>>, vector<128x256xbf16>
    %cst_8 = arith.constant dense<0.000000e+00> : vector<8x256xf32>
    %10 = tpu.matmul %8, %9, %cst_8 {dimension_numbers = #tpu.dot_dimension_numbers<[1], [0], [0], [1], [0, 0, 1, 1], [], []>} : vector<8x128xbf16>, vector<128x256xbf16>, vector<8x256xf32> -> vector<8x256xf32>
    %c0_9 = arith.constant 0 : index
    %c0_10 = arith.constant 0 : index
    %11 = vector.load %arg5[%c0_9, %c0_10] : memref<1x256xf32, #tpu.memory_space<vmem>>, vector<1x256xf32>
    %12 = vector.broadcast %11 : vector<1x256xf32> to vector<8x256xf32>
    %13 = arith.addf %10, %12 : vector<8x256xf32>
    %c0_11 = arith.constant 0 : index
    %c0_12 = arith.constant 0 : index
    %14 = vector.load %arg6[%c0_11, %c0_12] : memref<8x256xf32, #tpu.memory_space<vmem>>, vector<8x256xf32>
    tpu.vector_store %arg6[%c0_11, %c0_12], %13 {strides = array<i32>} : memref<8x256xf32, #tpu.memory_space<vmem>>, vector<8x256xf32>,
    %15 = arith.negf %13 : vector<8x256xf32>
    %16 = math.exp %15 : vector<8x256xf32>
    %cst_13 = arith.constant 1.000000e+00 : f32
    %17 = vector.broadcast %cst_13 : f32 to vector<8x256xf32>
    %18 = arith.addf %17, %16 : vector<8x256xf32>
    %19 = arith.divf %17, %18 : vector<8x256xf32>
    %c0_14 = arith.constant 0 : index
    %c0_15 = arith.constant 0 : index
    %20 = vector.load %arg7[%c0_14, %c0_15] : memref<8x256xf32, #tpu.memory_space<vmem>>, vector<8x256xf32>
    tpu.vector_store %arg7[%c0_14, %c0_15], %19 {strides = array<i32>} : memref<8x256xf32, #tpu.memory_space<vmem>>, vector<8x256xf32>,
    return
  }
  func.func @transform_0(%arg0: i32) -> (i32, i32) {
    %c0_i32 = arith.constant 0 : i32
    %c0_i32_0 = arith.constant 0 : i32
    return %arg0, %c0_i32 : i32, i32
  }
  func.func @transform_1(%arg0: i32) -> (i32, i32) {
    %c0_i32 = arith.constant 0 : i32
    %c0_i32_0 = arith.constant 0 : i32
    %c0_i32_1 = arith.constant 0 : i32
    return %c0_i32, %c0_i32_0 : i32, i32
  }
  func.func @transform_2(%arg0: i32) -> (i32, i32) {
    %c0_i32 = arith.constant 0 : i32
    %c0_i32_0 = arith.constant 0 : i32
    %c0_i32_1 = arith.constant 0 : i32
    return %c0_i32, %c0_i32_0 : i32, i32
  }
  func.func @transform_3(%arg0: i32) -> (i32, i32) {
    %c0_i32 = arith.constant 0 : i32
    %c0_i32_0 = arith.constant 0 : i32
    %c0_i32_1 = arith.constant 0 : i32
    return %c0_i32, %c0_i32_0 : i32, i32
  }
  func.func @transform_4(%arg0: i32) -> (i32, i32) {
    %c0_i32 = arith.constant 0 : i32
    %c0_i32_0 = arith.constant 0 : i32
    %c0_i32_1 = arith.constant 0 : i32
    return %c0_i32, %c0_i32_0 : i32, i32
  }
  func.func @transform_5(%arg0: i32) -> (i32, i32) {
    %c0_i32 = arith.constant 0 : i32
    %c0_i32_0 = arith.constant 0 : i32
    return %arg0, %c0_i32 : i32, i32
  }
  func.func @transform_6(%arg0: i32) -> (i32, i32) {
    %c0_i32 = arith.constant 0 : i32
    %c0_i32_0 = arith.constant 0 : i32
    return %arg0, %c0_i32 : i32, i32
  }
}

</mosaic_0001>

<bundles_post_ra>
// kernel: tpu_custom_call.1
= control target key start
LH: loop header
LB: loop body
LE: loop exit
PB: predicated region body
PF: predicated region fallthrough
CT: control target
= control target key end

     0   :  { %12 = vsyncpa [#allocation3], 0  ;;  %s712_s0 = inlined_call_operand.hbm [shape: bf16[8,128], index: 0, kind: input, shape index: {}]   ;;  %s713_s1 = inlined_call_operand.hbm [shape: bf16[128,128], index: 1, kind: input, shape index: {}]   ;;  %s714_s2 = inlined_call_operand.vmem [shape: f32[1,128], index: 2, kind: input, shape index: {}]   ;;  %s715_s3 = inlined_call_operand.hbm [shape: bf16[128,256], index: 3, kind: input, shape index: {}]   ;;  %s716_s4 = inlined_call_operand.vmem [shape: f32[1,256], index: 4, kind: input, shape index: {}]   ;;  %s717_s5 = inlined_call_operand.hbm [shape: f32[8,256], index: 5, kind: output, shape index: {0}]   ;;  %s718_s6 = inlined_call_operand.hbm [shape: f32[8,256], index: 6, kind: output, shape index: {1}]  }
   0x1   :  { %13 = vsyncpa [#allocation6], 0 }
   0x2   :  { %14 = vsyncpa [#allocation4], 0 }
   0x3   :  { %15 = vsyncpa [#allocation10], 0  ;;  %s599_s21 = smov [#allocation5]   ;;  %s481_s25 = scalar_lea.hbm %s713_s1, 1024 }
   0x4   :  { %s31_s22 = sshll.u32 %s599_s21, 4  ;;  %p482_p0 = scmp.ne.s32.totalorder %s713_s1, %s481_s25  ;;  %s32_s22 = int_to_ptr.vmem [resolvable:$true] %s31_s22 }
   0x5   :  { %p485_p1 = scmp.lt.u32.totalorder %s481_s25, %s713_s1 }
   0x7   :  { %p487_p2 = pnand %p485_p1, %p482_p0 }
   0x9   :  { %490 = shalt.err (!%p487_p2)
}
   0xa   :  { %s491_s30 = scalar_lea.vmem %s32_s22, 1024  ;;  %p496_p4 = scmp.lt.s32.totalorder %s32_s22, %s32_s22 }
   0xb   :  { %p492_p3 = scmp.ne.s32.totalorder %s32_s22, %s491_s30  ;;  %p497_p5 = scmp.lt.s32.totalorder %s491_s30, %s491_s30 }
   0xd   :  { %p498_p6 = por %p497_p5, %p496_p4 }
   0xf   :  { %p499_p7 = pnand %p498_p6, %p492_p3 }
  0x11   :  { %502 = shalt.err (!%p499_p7)
}
  0x12   :  { %s600_s7 = smov 64   ;;  %s601_s8 = smov 4  }
  0x13   :  { %37 = dma.hbm_to_vmem [thread:$0]  %s713_s1, 1024, %s32_s22, [#allocation6], %s600_s7, %s600_s7, %s601_s8  }
  0x14   :  { %s602_s11 = smov [#allocation2]   ;;  %s603_s13 = smov [#allocation7]  }
  0x15   :  { %s22_s12 = sshll.u32 %s602_s11, 4  ;;  %s45_s14 = sshll.u32 %s603_s13, 4  ;;  %s23_s12 = int_to_ptr.vmem [resolvable:$true] %s22_s12  ;;  %s46_s14 = int_to_ptr.vmem [resolvable:$true] %s45_s14 }
  0x16   :  { %s503_s17 = scalar_lea.hbm %s712_s0, 64 }
  0x17   :  { %p504_p8 = scmp.ne.s32.totalorder %s712_s0, %s503_s17  ;;  %p507_p9 = scmp.lt.u32.totalorder %s503_s17, %s712_s0 }
  0x19   :  { %p509_p10 = pnand %p507_p9, %p504_p8 }
  0x1b   :  { %512 = shalt.err (!%p509_p10)
}
  0x1c   :  { %s513_s1 = scalar_lea.vmem %s23_s12, 64  ;;  %p518_p12 = scmp.lt.s32.totalorder %s23_s12, %s23_s12 }
  0x1d   :  { %p514_p11 = scmp.ne.s32.totalorder %s23_s12, %s513_s1  ;;  %p519_p13 = scmp.lt.s32.totalorder %s513_s1, %s513_s1 }
  0x1f   :  { %p520_p0 = por %p519_p13, %p518_p12 }
  0x21   :  { %p521_p1 = pnand %p520_p0, %p514_p11 }
  0x23   :  { %524 = shalt.err (!%p521_p1)
}
  0x24   :  { %25 = dma.hbm_to_vmem [thread:$0]  %s712_s0, 64, %s23_s12, [#allocation3]  }
  0x25   :  { %s525_s26 = scalar_lea.hbm %s715_s3, 2048 }
  0x26   :  { %p526_p2 = scmp.ne.s32.totalorder %s715_s3, %s525_s26  ;;  %p529_p3 = scmp.lt.u32.totalorder %s525_s26, %s715_s3 }
  0x28   :  { %p531_p4 = pnand %p529_p3, %p526_p2 }
  0x2a   :  { %534 = shalt.err (!%p531_p4)
}
  0x2b   :  { %s535_s7 = scalar_lea.vmem %s46_s14, 2048  ;;  %p540_p6 = scmp.lt.s32.totalorder %s46_s14, %s46_s14 }
  0x2c   :  { %p536_p5 = scmp.ne.s32.totalorder %s46_s14, %s535_s7  ;;  %p541_p7 = scmp.lt.s32.totalorder %s535_s7, %s535_s7 }
  0x2e   :  { %p542_p8 = por %p541_p7, %p540_p6 }
  0x30   :  { %p543_p9 = pnand %p542_p8, %p536_p5 }
  0x32   :  { %546 = shalt.err (!%p543_p9)
}
  0x33   :  { %s604_s0 = smov 128   ;;  %s605_s8 = smov 8  }
  0x34   :  { %51 = dma.hbm_to_vmem [thread:$0]  %s715_s3, 2048, %s46_s14, [#allocation6], %s604_s0, %s604_s0, %s605_s8  }
  0x35   :  { %591 = dma.done.wait [#allocation3], 64  }
  0x36   :  { %592 = vsyncadd [#allocation3], 4294967232 }
  0x37   :  { %593 = dma.done.wait [#allocation6], 3072  }
  0x38   :  { %594 = vsyncadd [#allocation6], 4294964224  ;;  %v606_v0 = vmov 0.0   ;;  %vm607_vm0 = vmmov 0   ;;  %v441_v1 = vld [vmem:[#allocation5] sm:$0xff]   ;;  %v442_v2 = vld [vmem:[#allocation5 + $0x8] sm:$0xff]   ;;  %v196_v35 = vlaneseq }
  0x39   :  { %409 = vmatprep.subr.bf16.mxu0 %v606_v0  ;;  %425 = vmatprep.mubr.msk.bf16.mxu0 %vm607_vm0, %v606_v0  ;;  %v443_v3 = vld [vmem:[#allocation5 + $0x10] sm:$0xff]   ;;  %v449_v4 = vld [vmem:[#allocation7 + $0x4] ss:$8 sps:$4 sm:$0xff]   ;;  %v451_v5 = vld [vmem:[#allocation7] ss:$8 sps:$4 sm:$0xff]   ;;  %v608_v26 = vmov 0  }
  0x3a   :  { %410 = vmatpush3.bf16.msra.mxu0 %v441_v1  ;;  %v444_v6 = vld [vmem:[#allocation5 + $0x18] sm:$0xff]   ;;  %286 = vmatprep.subr.bf16.mxu1 %v449_v4  ;;  %v455_v9 = vld [vmem:[#allocation7 + $0x24] ss:$8 sps:$4 sm:$0xff]   ;;  %v457_v11 = vld [vmem:[#allocation7 + $0x20] ss:$8 sps:$4 sm:$0xff]   ;;  %v197_v36 = vshrl.u32 %v196_v35, 7 }
  0x3b   :  { %411 = vmatprep.subr.bf16.mxu0 %v606_v0  ;;  %v452_v7 = vld [vmem:[#allocation7 + $0x14] ss:$8 sps:$4 sm:$0xff]   ;;  %287 = vmatpush1.bf16.msra.mxu1 %v451_v5  ;;  %v454_v8 = vld [vmem:[#allocation7 + $0x10] ss:$8 sps:$4 sm:$0xff]   ;;  %v445_v10 = vld [vmem:[#allocation5 + $0x20] sm:$0xff]   ;;  %s609_s14 = smov [#allocation8]  }
  0x3c   :  { %288 = vmatprep.subr.bf16.mxu1 %v452_v7  ;;  %v458_v12 = vld [vmem:[#allocation7 + $0x34] ss:$8 sps:$4 sm:$0xff]   ;;  %v446_v13 = vld [vmem:[#allocation5 + $0x28] sm:$0xff]   ;;  %v460_v14 = vld [vmem:[#allocation7 + $0x30] ss:$8 sps:$4 sm:$0xff]   ;;  %318 = vmatprep.mubr.bf16.mxu1 %v608_v26  ;;  %v198_v37 = vsub.s32 0, %v197_v36 }
  0x3d   :  { %v461_v15 = vld [vmem:[#allocation7 + $0x44] ss:$8 sps:$4 sm:$0xff]   ;;  %v447_v16 = vld [vmem:[#allocation5 + $0x30] sm:$0xff]   ;;  %v463_v17 = vld [vmem:[#allocation7 + $0x40] ss:$8 sps:$4 sm:$0xff]   ;;  %v202_v39 = vsub.s32 1, %v197_v36 }
  0x3e   :  { %412 = vmatpush3.bf16.msra.mxu0 %v442_v2  ;;  %v464_v18 = vld [vmem:[#allocation7 + $0x54] ss:$8 sps:$4 sm:$0xff]   ;;  %v466_v20 = vld [vmem:[#allocation7 + $0x50] ss:$8 sps:$4 sm:$0xff]   ;;  %v467_v21 = vld [vmem:[#allocation7 + $0x64] ss:$8 sps:$4 sm:$0xff]  }
  0x3f   :  { %413 = vmatprep.subr.bf16.mxu0 %v606_v0  ;;  %289 = vmatpush1.bf16.msra.mxu1 %v454_v8  ;;  %v448_v19 = vld [vmem:[#allocation5 + $0x38] sm:$0xff]   ;;  %v469_v23 = vld [vmem:[#allocation7 + $0x60] ss:$8 sps:$4 sm:$0xff]  }
  0x40   :  { %290 = vmatprep.subr.bf16.mxu1 %v455_v9  ;;  %v64_v22 = vld [vmem:[#allocation2] sm:$0xf]  ;;  %v472_v25 = vld [vmem:[#allocation7 + $0x70] ss:$8 sps:$4 sm:$0xff]  }
  0x41   :  { %v470_v24 = vld [vmem:[#allocation7 + $0x74] ss:$8 sps:$4 sm:$0xff]  }
  0x42   :  { %414 = vmatpush3.bf16.msra.mxu0 %v443_v3  ;;  %v373_v27 = vld [vmem:[%s714_s2] ss:$0 sm:$0xff]  ;;  %s349_s2 = sshll.u32 %s609_s14, 4  ;;  %s350_s2 = int_to_ptr.vmem [resolvable:$true] %s349_s2 }
  0x43   :  { %415 = vmatprep.subr.bf16.mxu0 %v606_v0  ;;  %291 = vmatpush1.bf16.msra.mxu1 %v457_v11  ;;  %v194_v38 = vld [vmem:[%s716_s4] sm:$0x3]  ;;  %s547_s15 = scalar_lea.vmem %s350_s2, 256  ;;  %p552_p11 = scmp.lt.s32.totalorder %s350_s2, %s350_s2 }
  0x44   :  { %292 = vmatprep.subr.bf16.mxu1 %v458_v12  ;;  %v199_v40 = vrot.slane %v194_v38, %v198_v37  ;;  %v203_v41 = vrot.slane %v194_v38, %v202_v39  ;;  %p548_p10 = scmp.ne.s32.totalorder %s350_s2, %s547_s15  ;;  %p553_p12 = scmp.lt.s32.totalorder %s547_s15, %s547_s15 }
  0x46   :  { %416 = vmatpush3.bf16.msra.mxu0 %v444_v6  ;;  %p554_p13 = por %p553_p12, %p552_p11 }
  0x47   :  { %417 = vmatprep.subr.bf16.mxu0 %v606_v0  ;;  %293 = vmatpush1.bf16.msra.mxu1 %v460_v14 }
  0x48   :  { %294 = vmatprep.subr.bf16.mxu1 %v461_v15  ;;  %p555_p0 = pnand %p554_p13, %p548_p10 }
  0x4a   :  { %418 = vmatpush3.bf16.msra.mxu0 %v445_v10 }
  0x4b   :  { %419 = vmatprep.subr.bf16.mxu0 %v606_v0  ;;  %295 = vmatpush1.bf16.msra.mxu1 %v463_v17 }
  0x4c   :  { %296 = vmatprep.subr.bf16.mxu1 %v464_v18 }
  0x4e   :  { %420 = vmatpush3.bf16.msra.mxu0 %v446_v13 }
  0x4f   :  { %421 = vmatprep.subr.bf16.mxu0 %v606_v0  ;;  %297 = vmatpush1.bf16.msra.mxu1 %v466_v20 }
  0x50   :  { %298 = vmatprep.subr.bf16.mxu1 %v467_v21 }
  0x52   :  { %422 = vmatpush3.bf16.msra.mxu0 %v447_v16 }
  0x53   :  { %423 = vmatprep.subr.bf16.mxu0 %v606_v0  ;;  %299 = vmatpush1.bf16.msra.mxu1 %v469_v23 }
  0x54   :  { %300 = vmatprep.subr.bf16.mxu1 %v470_v24 }
  0x56   :  { %424 = vmatpush3.bf16.msra.mxu0 %v448_v19 }
  0x57   :  { %301 = vmatpush1.bf16.msra.mxu1 %v472_v25 }
  0x59   :  { %426 = vmatmul.mubr.bf16.vlgmr.msra.gmra.mrb[0].mxu0 %v64_v22 }
 0x12c   :  { %v170_v28 = vpop.f32.mrb[0].mxu0 }
 0x12d   :  { %v171_v29 = vadd.f32 %v373_v27, %v170_v28  ;;  %v427_v30 = vpop.f32.mrb[1].mxu0 }
 0x12e   :  { %v173_v31 = vpop.f32.mrb[2].mxu0 }
 0x12f   :  { %v176_v32 = vmax.f32 %v171_v29, 0.0  ;;  %v428_v33 = vpop.f32.mrb[3].mxu0 }
 0x131   :  { %v177_v34 = vpack.c.bf16 %v176_v32, %v176_v32 }
 0x133   :  { %319 = vmatmul.mubr.bf16.vlgmr.msra.gmra.mrb[0].mxu1 %v177_v34 }
 0x206   :  { %v320_v42 = vpop.f32.mrb[0].mxu1 }
 0x207   :  { %v321_v43 = vadd.f32 %v320_v42, %v199_v40  ;;  %v322_v44 = vpop.f32.mrb[1].mxu1 }
 0x208   :  { %v323_v45 = vadd.f32 %v322_v44, %v203_v41  ;;  %v324_v46 = vpop.f32.mrb[2].mxu1 }
 0x209   :  { %327 = vst [vmem:[#allocation8] sm:$0xff] %v321_v43  ;;  %v398_v47 = vmul.f32 -1.442695, %v321_v43  ;;  %v325_v48 = vpop.f32.mrb[3].mxu1 }
 0x20a   :  { %328 = vst [vmem:[#allocation8 + $0x8] sm:$0xff] %v323_v45  ;;  %v399_v49 = vmul.f32 -1.442695, %v323_v45 }
 0x20b   :  { %473 = vpow2.f32 %v398_v47 }
 0x20c   :  { %558 = shalt.err (!%p555_p0)
}
 0x20d   :  { %s559_s17 = scalar_lea.hbm %s717_s5, 256 }
 0x20e   :  { %p560_p1 = scmp.ne.s32.totalorder %s717_s5, %s559_s17  ;;  %p563_p2 = scmp.lt.u32.totalorder %s559_s17, %s717_s5 }
 0x210   :  { %p565_p3 = pnand %p563_p2, %p560_p1 }
 0x212   :  { %568 = shalt.err (!%p565_p3)
}
 0x213   :  { %352 = dma.vmem_to_hbm [thread:$0]  %s350_s2, 256, %s717_s5, [#allocation4]   ;;  %475 = vpow2.f32 %v399_v49 }
 0x214   :  { %s610_s23 = smov [#allocation9]  }
 0x215   :  { %v474_v50 = vpop.eup %473  ;;  %s359_s24 = sshll.u32 %s610_s23, 4  ;;  %s360_s24 = int_to_ptr.vmem [resolvable:$true] %s359_s24 }
 0x216   :  { %v335_v52 = vadd.f32 1.0, %v474_v50  ;;  %s569_s25 = scalar_lea.vmem %s360_s24, 256  ;;  %p574_p5 = scmp.lt.s32.totalorder %s360_s24, %s360_s24 }
 0x217   :  { %p570_p4 = scmp.ne.s32.totalorder %s360_s24, %s569_s25  ;;  %p575_p6 = scmp.lt.s32.totalorder %s569_s25, %s569_s25 }
 0x218   :  { %477 = vrcp.f32 %v335_v52 }
 0x219   :  { %p576_p7 = por %p575_p6, %p574_p5 }
 0x21b   :  { %p577_p8 = pnand %p576_p7, %p570_p4 }
 0x21d   :  { %v476_v51 = vpop.eup %475 }
 0x21e   :  { %v336_v53 = vadd.f32 1.0, %v476_v51 }
 0x220   :  { %479 = vrcp.f32 %v336_v53 }
 0x222   :  { %v478_v54 = vpop.eup %477 }
 0x223   :  { %341 = vst [vmem:[#allocation9] sm:$0xff] %v478_v54 }
 0x22a   :  { %v480_v55 = vpop.eup %479 }
 0x22b   :  { %342 = vst [vmem:[#allocation9 + $0x8] sm:$0xff] %v480_v55 }
 0x22c   :  { %580 = shalt.err (!%p577_p8)
}
 0x22d   :  { %s581_s27 = scalar_lea.hbm %s718_s6, 256 }
 0x22e   :  { %p582_p9 = scmp.ne.s32.totalorder %s718_s6, %s581_s27  ;;  %p585_p10 = scmp.lt.u32.totalorder %s581_s27, %s718_s6 }
 0x230   :  { %p587_p11 = pnand %p585_p10, %p582_p9 }
 0x232   :  { %590 = shalt.err (!%p587_p11)
}
 0x233   :  { %362 = dma.vmem_to_hbm [thread:$0]  %s360_s24, 256, %s718_s6, [#allocation10]  }
 0x234   :  { %595 = dma.done.wait [#allocation4], 256  }
 0x235   :  { %596 = vsyncadd [#allocation4], 4294967040 }
 0x236   :  { %597 = dma.done.wait [#allocation10], 256  }
 0x237   :  { %598 = vsyncadd [#allocation10], 4294967040 }
 0x238   :  { %369 = vsyncpa [#allocation3], 1 }
 0x239   :  { %370 = vsyncpa [#allocation6], 1 }
 0x23a   :  { %371 = vsyncpa [#allocation4], 1 }
 0x23b   :  { %372 = vsyncpa [#allocation10], 1 }

</bundles_post_ra>
